<compile_context>
chip_gen: v6e
topology: v6e:2x2x1
jax: 0.10.0
libtpu: 0.0.40
codegen_flags: <defaults>
</compile_context>

<pallas_src>
import math

import jax
import jax.numpy as jnp
from jax.experimental import pallas as pl
from jax.experimental.pallas import tpu as pltpu


NONZERO_NODES_INDEX = (9,)        # static default, as in the PyTorch module

DEFAULT_BATCH_TILE = 8192         # target rows of f per grid step
_MIN_SPLIT = 256                  # below 2*this, a single grid step is best
_VMEM_PER_INPUT_BUFFER = 4 << 20  # ~4 MiB per (double-buffered) input block
_SMALL_PROBLEM_BYTES = 256 << 10  # below this, pure-JAX gather beats a launch


def _coalesce_runs(indices):
    """Group consecutive node indices so a run of R adjacent nodes moves as one
    (tb, R*D) slab instead of R separate copies (review item: coalesce K)."""
    runs = []
    k, K = 0, len(indices)
    while k < K:
        j = k
        while j + 1 < K and indices[j + 1] == indices[j] + 1:
            j += 1
        runs.append((k, indices[k], j - k + 1))   # (out_pos, src_node, run_len)
        k = j + 1
    return tuple(runs)


def _make_select_kernel(runs, D):
    """Kernel body: x_ref is a (tb, N*D) lane-dense block, o_ref a (tb, K*D)
    block.  Pure vector copies via static lane slices; all HBM traffic is
    full-burst contiguous DMA handled by the BlockSpec pipeline."""

    def kernel(x_ref, o_ref):
        for out_pos, src_node, run_len in runs:
            o_ref[:, out_pos * D:(out_pos + run_len) * D] = (
                x_ref[:, src_node * D:(src_node + run_len) * D]
            )

    return kernel


def _pick_batch_tile(B, requested, row_bytes):
    """Choose the batch tile (second-to-last block dim)."""
    # Largest tile whose input block stays under the per-buffer VMEM budget.
    cap = max(8, (_VMEM_PER_INPUT_BUFFER // max(row_bytes, 1)) // 8 * 8)
    if requested is not None:
        tb = max(1, min(int(requested), B, cap))
    else:
        if B <= 2 * _MIN_SPLIT:
            tb = B                               # one step; overhead-dominated
        else:
            # >= 2 grid steps so both v7x TensorCores get work; single-TC
            # v5e/v6e still see large (~8K-row) tiles that amortize the
            # ~0.35 us per-step overhead and keep DMA descriptor runs long.
            nb = max(2, pl.cdiv(B, DEFAULT_BATCH_TILE))
            tb = ((pl.cdiv(B, nb) + 7) // 8) * 8
        tb = min(tb, cap)
    if tb < B:
        tb = max(8, (tb // 8) * 8)   # sublane-aligned when it doesn't cover B
    return max(1, min(tb, B))


def _encoder_f_pallas(f2, runs, K, D, tb):
    """Single pallas_call over rows of f2 (shape (B, N*D)) -> (B, K*D)."""
    B, ND = f2.shape
    itemsize = f2.dtype.itemsize
    nb = pl.cdiv(B, tb)

    return pl.pallas_call(
        _make_select_kernel(runs, D),
        out_shape=jax.ShapeDtypeStruct((B, K * D), f2.dtype),
        grid_spec=pltpu.PrefetchScalarGridSpec(
            num_scalar_prefetch=0,
            grid=(nb,),
            # Lane-dense contiguous (tb, N*D) input rows; the ragged tail
            # block of an uneven batch is bounds-clamped by the pipeline.
            in_specs=[pl.BlockSpec((tb, ND), lambda b: (b, 0))],
            # Lane-dense (tb, K*D) output block: no per-row (8,128) padding,
            # dense writeback.
            out_specs=pl.BlockSpec((tb, K * D), lambda b: (b, 0)),
        ),
        compiler_params=pltpu.CompilerParams(
            dimension_semantics=("parallel",),   # batch tiles are independent
        ),
        cost_estimate=pl.CostEstimate(
            flops=0,
            transcendentals=0,
            bytes_accessed=(B * ND + B * K * D) * itemsize,
        ),
    )(f2)


def encoder_f_reference(f, nonzero_nodes_index=NONZERO_NODES_INDEX):
    """Pure-JAX reference matching the PyTorch forward exactly."""
    idx = jnp.asarray([int(i) for i in nonzero_nodes_index], dtype=jnp.int32)
    sel = jnp.take(jnp.asarray(f), idx, axis=-2)               # (..., K, D)
    return sel.reshape(sel.shape[:-2] + (sel.shape[-2] * sel.shape[-1],))


def encoder_f(f, nonzero_nodes_index=NONZERO_NODES_INDEX, batch_tile=None,
              force_pallas=False):
    """Pallas implementation of EncoderF.forward.

    f: array of shape (..., N, D).  Returns (..., K*D) with
    K = len(nonzero_nodes_index); dtype preserved (byte-exact gather).
    """
    f = jnp.asarray(f)
    if f.ndim < 2:
        raise ValueError("EncoderF expects f of shape (..., N, D)")
    *lead, N, D = f.shape

    # Validate & normalize the static node indices (torch-style negatives ok).
    indices = []
    for idx in nonzero_nodes_index:
        idx = int(idx)
        if not (-N <= idx < N):
            raise IndexError(f"nonzero node index {idx} out of range for N={N}")
        indices.append(idx % N)
    indices = tuple(indices)
    K = len(indices)

    B = math.prod(lead)
    itemsize = f.dtype.itemsize

    # Degenerate / tiny problems: a pallas_call launch costs more than the
    # whole byte movement — use XLA's fused gather instead.
    if B == 0 or K == 0 or D == 0 or (
            not force_pallas and B * N * D * itemsize < _SMALL_PROBLEM_BYTES):
        return encoder_f_reference(f, indices)

    # TODO(synk): for very large D with few selected nodes (D*itemsize >> 512 B
    # and K << N), add a scalar-prefetch node-gather path so unselected nodes
    # are never read from HBM; in the module's regime (N*D = 128 lanes) the
    # contiguous row read below is already at the HBM roofline.

    f2 = f.reshape(B, N * D)                              # free lane-dense view
    tb = _pick_batch_tile(B, batch_tile, N * D * itemsize)
    runs = _coalesce_runs(indices)
    out2 = _encoder_f_pallas(f2, runs, K, D, tb)          # (B, K*D)
    return out2.reshape(*lead, K * D)                     # free reshape


if __name__ == "__main__":
    key = jax.random.PRNGKey(0)

    # Case 1: module defaults — batch=2, N=16 nodes, D=8 dof, f32, K=1.
    B, N, D = 2, 16, 8
    f = jax.random.normal(key, (B, N, D), dtype=jnp.float32)
    ref = encoder_f_reference(f)
    out_fast = jax.block_until_ready(encoder_f(f))                   # fast path
    out_pal = jax.block_until_ready(encoder_f(f, force_pallas=True))  # kernel
    assert out_pal.shape == (B, len(NONZERO_NODES_INDEX) * D), out_pal.shape
    assert out_pal.dtype == f.dtype
    assert jnp.array_equal(out_fast, ref), "fast-path mismatch (f32, K=1)"
    assert jnp.array_equal(out_pal, ref), "pallas mismatch (f32, K=1)"

    # Case 2: extra leading dims, K=3 with a contiguous run (2,3), bf16.
    idx2 = (9, 2, 3)
    f2 = jax.random.normal(jax.random.PRNGKey(1), (3, 5, N, D),
                           dtype=jnp.bfloat16)
    out2 = jax.block_until_ready(encoder_f(f2, idx2, force_pallas=True))
    ref2 = encoder_f_reference(f2, idx2)
    assert out2.shape == (3, 5, len(idx2) * D), out2.shape
    assert out2.dtype == f2.dtype
    assert jnp.array_equal(out2, ref2), "pallas mismatch (bf16, K=3)"

    # Case 3: ragged batch -> multi-step grid with a masked tail block.
    f3 = jax.random.normal(jax.random.PRNGKey(2), (1000, N, D),
                           dtype=jnp.float32)
    out3 = jax.block_until_ready(encoder_f(f3, (9,), batch_tile=504))
    ref3 = encoder_f_reference(f3, (9,))
    assert out3.shape == (1000, D), out3.shape
    assert jnp.array_equal(out3, ref3), "pallas mismatch (ragged batch)"

    print("KERNEL_OK")
</pallas_src>

<mosaic_0001>
module attributes {stable_mosaic.version = 11 : i64} {
  func.func @kernel(%arg0: i32, %arg1: memref<2x128xf32, #tpu.memory_space<vmem>>, %arg2: memref<2x8xf32, #tpu.memory_space<vmem>>) attributes {dimension_semantics = [#tpu.dimension_semantics<parallel>], iteration_bounds = array<i64: 1>, scalar_prefetch = 0 : i64, scratch_operands = 0 : i64, tpu.core_type = #tpu.core_type<tc>, window_params = [{transform_indices = @transform_0, window_bounds = array<i64: 2, 128>}, {transform_indices = @transform_1, window_bounds = array<i64: 2, 8>}]} {
    %c0 = arith.constant 0 : index
    %c72 = arith.constant 72 : index
    %0 = vector.load %arg1[%c0, %c72] : memref<2x128xf32, #tpu.memory_space<vmem>>, vector<2x8xf32>
    %c0_0 = arith.constant 0 : index
    %c0_1 = arith.constant 0 : index
    %1 = vector.load %arg2[%c0_0, %c0_1] : memref<2x8xf32, #tpu.memory_space<vmem>>, vector<2x8xf32>
    tpu.vector_store %arg2[%c0_0, %c0_1], %0 {strides = array<i32>} : memref<2x8xf32, #tpu.memory_space<vmem>>, vector<2x8xf32>,
    return
  }
  func.func @transform_0(%arg0: i32) -> (i32, i32) {
    %c0_i32 = arith.constant 0 : i32
    %c0_i32_0 = arith.constant 0 : i32
    return %arg0, %c0_i32 : i32, i32
  }
  func.func @transform_1(%arg0: i32) -> (i32, i32) {
    %c0_i32 = arith.constant 0 : i32
    %c0_i32_0 = arith.constant 0 : i32
    return %arg0, %c0_i32 : i32, i32
  }
}

</mosaic_0001>

<bundles_post_ra>
// kernel: tpu_custom_call.1
= control target key start
LH: loop header
LB: loop body
LE: loop exit
PB: predicated region body
PF: predicated region fallthrough
CT: control target
= control target key end

     0   :  { %6 = vsyncpa [#allocation3], 0  ;;  %s109_s0 = inlined_call_operand.hbm [shape: f32[2,128], index: 0, kind: input, shape index: {}]   ;;  %s110_s1 = inlined_call_operand.hbm [shape: f32[2,8], index: 1, kind: output, shape index: {}]  }
   0x1   :  { %7 = vsyncpa [#allocation4], 0  ;;  %s90_s6 = smov [#allocation2]  }
   0x2   :  { %s14_s7 = sshll.u32 %s90_s6, 4  ;;  %s15_s7 = int_to_ptr.vmem [resolvable:$true] %s14_s7 }
   0x3   :  { %s54_s8 = scalar_lea.vmem %s15_s7, 32  ;;  %p59_p1 = scmp.lt.s32.totalorder %s15_s7, %s15_s7 }
   0x4   :  { %p55_p0 = scmp.ne.s32.totalorder %s15_s7, %s54_s8  ;;  %p60_p2 = scmp.lt.s32.totalorder %s54_s8, %s54_s8 }
   0x6   :  { %p61_p3 = por %p60_p2, %p59_p1 }
   0x8   :  { %p62_p4 = pnand %p61_p3, %p55_p0 }
   0xa   :  { %65 = shalt.err (!%p62_p4)
}
   0xb   :  { %17 = dma.hbm_to_vmem [thread:$0]  %s109_s0, 32, %s15_s7, [#allocation3]  }
   0xc   :  { %86 = dma.done.wait [#allocation3], 32  }
   0xd   :  { %87 = vsyncadd [#allocation3], 4294967264  ;;  %v21_v0 = vld [vmem:[#allocation2] sm:$0x3]  ;;  %s91_s11 = smov 56   ;;  %s92_s12 = smov [#allocation5]  }
   0xe   :  { %23 = vrot.lane.b32.xlu0 %v21_v0, %s91_s11  ;;  %s34_s13 = sshll.u32 %s92_s12, 4  ;;  %vm26_vm0 = vcmask 58368   ;;  %s35_s13 = int_to_ptr.vmem [resolvable:$true] %s34_s13 }
   0xf   :  { %s66_s14 = scalar_lea.vmem %s35_s13, 32  ;;  %p71_p6 = scmp.lt.s32.totalorder %s35_s13, %s35_s13 }
  0x10   :  { %p67_p5 = scmp.ne.s32.totalorder %s35_s13, %s66_s14  ;;  %p72_p7 = scmp.lt.s32.totalorder %s66_s14, %s66_s14 }
  0x12   :  { %p73_p8 = por %p72_p7, %p71_p6 }
  0x14   :  { %p74_p9 = pnand %p73_p8, %p67_p5 }
  0x80   :  { %v24_v1 = vpop.permute.xlu0 %23 }
  0x81   :  { %27 = vst.msk [vmem:[#allocation5] sm:$0x3] %vm26_vm0, %v24_v1 }
  0x82   :  { %77 = shalt.err (!%p74_p9)
}
  0x83   :  { %37 = dma.vmem_to_hbm [thread:$0]  %s35_s13, 32, %s110_s1, [#allocation4]  }
  0x84   :  { %88 = dma.done.wait [#allocation4], 32  }
  0x85   :  { %89 = vsyncadd [#allocation4], 4294967264 }
  0x86   :  { %41 = vsyncpa [#allocation3], 1 }
  0x87   :  { %42 = vsyncpa [#allocation4], 1 }

</bundles_post_ra>
